<compile_context>
chip_gen: v7x
topology: tpu7x:2x2x1
jax: 0.10.0
libtpu: 0.0.40
codegen_flags: <defaults>
</compile_context>

<pallas_src>
import functools

import jax
import jax.numpy as jnp
import numpy as np
from jax import lax
from jax.experimental import pallas as pl
from jax.experimental.pallas import tpu as pltpu


def _round_up(x, m):
    return ((x + m - 1) // m) * m


# ----------------------------------------------------------------------------
# 1. Pixel normalization: (x - mean) * inv_std, lane-dense flat layout.
# ----------------------------------------------------------------------------
def _normalize_kernel(x_ref, mean_ref, inv_std_ref, o_ref):
    # x_ref/o_ref: (1, C, T) with T a multiple of 128 ; mean/inv_std: (C, 1)
    o_ref[0] = (x_ref[0] - mean_ref[...]) * inv_std_ref[...]


def pixel_normalize(x, pixel_mean, pixel_std, *, hw_tile=131072):
    """x: (N, C, H, W) -> (N, C, H, W) f32, (x - mean) / std per channel."""
    N, C, H, W = x.shape
    HW = H * W
    xf = x.reshape(N, C, HW).astype(jnp.float32)      # free reshape, lane axis = HW
    t = min(_round_up(HW, 128), _round_up(hw_tile, 128))
    n_t = pl.cdiv(HW, t)
    mean2 = pixel_mean.reshape(C, 1).astype(jnp.float32)
    inv_std2 = (1.0 / pixel_std).reshape(C, 1).astype(jnp.float32)  # hoisted reciprocal

    out = pl.pallas_call(
        _normalize_kernel,
        out_shape=jax.ShapeDtypeStruct((N, C, HW), jnp.float32),
        grid=(N, n_t),
        in_specs=[
            pl.BlockSpec((1, C, t), lambda n, j: (n, 0, j)),
            pl.BlockSpec((C, 1), lambda n, j: (0, 0)),
            pl.BlockSpec((C, 1), lambda n, j: (0, 0)),
        ],
        out_specs=pl.BlockSpec((1, C, t), lambda n, j: (n, 0, j)),
        compiler_params=pltpu.CompilerParams(
            dimension_semantics=("parallel", "parallel")),
        cost_estimate=pl.CostEstimate(
            flops=2 * N * C * HW,
            transcendentals=0,
            bytes_accessed=2 * N * C * HW * 4),
    )(xf, mean2, inv_std2)
    return out.reshape(N, C, H, W)


# ----------------------------------------------------------------------------
# 2. Controller conv (3x3, stride 1, pad 1) with in-kernel im2col on the MXU.
#    Layout trick: flatten the zero-padded feature map spatially; every tap of
#    the 3x3 window becomes a pure flat shift (static lane offset), and the
#    output is computed channel-major over padded positions so no transpose is
#    ever needed.  Border positions are garbage and sliced off in the wrapper.
# ----------------------------------------------------------------------------
def _controller_conv_kernel(x_ref, w_ref, b_ref, o_ref, *, taps, q_tile):
    # x_ref: (1, 1, Cin, Whalo) bf16  -- one overlapping q-window (band + halo)
    # w_ref: (9, Cout, Cin) bf16 ; b_ref: (Cout, 1) f32 ; o_ref: (1, Cout, QT) f32
    cout = o_ref.shape[1]
    acc = jnp.zeros((cout, q_tile), jnp.float32)
    for k, delta in enumerate(taps):                     # 9 static taps
        a = x_ref[0, 0, :, delta:delta + q_tile]         # (Cin, QT) static slice
        acc = acc + jnp.dot(w_ref[k], a, preferred_element_type=jnp.float32)
    o_ref[0] = acc + b_ref[...]


def controller_conv(x, weight, bias, *, q_tile=2048):
    """3x3/s1/p1 conv. x: (N,Cin,H,W) NCHW, weight: (Cout,Cin,3,3) -> (N,Cout,H,W)."""
    N, Cin, H, W = x.shape
    Cout = weight.shape[0]
    Hp, Wp = H + 2, W + 2
    Q = Hp * Wp                      # padded spatial positions (flat)
    E = Wp + 1                       # flat offset of the conv centre tap
    QT = min(_round_up(Q, 128), _round_up(q_tile, 128))
    n_q = pl.cdiv(Q, QT)
    Q_total = n_q * QT
    Whalo = _round_up(QT + 2 * E, 128)
    Lp = (n_q - 1) * QT + Whalo

    # Flatten + halo-pad once (cheap XLA passes over the input; replaces the
    # 9x im2col patches tensor), cast to bf16 for the MXU (f32 accumulate).
    xp = jnp.pad(x, ((0, 0), (0, 0), (1, 1), (1, 1)))
    xf = jnp.pad(xp.reshape(N, Cin, Q), ((0, 0), (0, 0), (E, Lp - Q - E)))
    xf = xf.astype(jnp.bfloat16)
    # Overlapping q-windows so every in-kernel tap slice is a static offset.
    xt = jnp.stack(
        [lax.slice_in_dim(xf, j * QT, j * QT + Whalo, axis=2) for j in range(n_q)],
        axis=1)                                              # (N, n_q, Cin, Whalo)

    w_taps = weight.reshape(Cout, Cin, 9).transpose(2, 0, 1).astype(jnp.bfloat16)
    b2 = bias.reshape(Cout, 1).astype(jnp.float32)
    taps = tuple(ky * Wp + kx for ky in range(3) for kx in range(3))

    kern = functools.partial(_controller_conv_kernel, taps=taps, q_tile=QT)
    out = pl.pallas_call(
        kern,
        out_shape=jax.ShapeDtypeStruct((N, Cout, Q_total), jnp.float32),
        grid=(N, n_q),
        in_specs=[
            pl.BlockSpec((1, 1, Cin, Whalo), lambda n, j: (n, j, 0, 0)),
            pl.BlockSpec((9, Cout, Cin), lambda n, j: (0, 0, 0)),   # resident weights
            pl.BlockSpec((Cout, 1), lambda n, j: (0, 0)),
        ],
        out_specs=pl.BlockSpec((1, Cout, QT), lambda n, j: (n, 0, j)),
        compiler_params=pltpu.CompilerParams(
            dimension_semantics=("parallel", "parallel")),
        cost_estimate=pl.CostEstimate(
            flops=2 * N * Q_total * Cout * Cin * 9,
            transcendentals=0,
            bytes_accessed=N * n_q * Cin * Whalo * 2 + N * Cout * Q_total * 4),
    )(xt, w_taps, b2)

    # Un-flatten and drop the halo border; output stays NCHW with no transpose.
    return out[:, :, :Q].reshape(N, Cout, Hp, Wp)[:, :, 1:1 + H, 1:1 + W]


# ----------------------------------------------------------------------------
# 3. get_images_color_similarity (unfold_wo_center + L2 + exp + mask), batched.
#    Same flat-shift trick: all 8 neighbour taps are static contiguous slices
#    of the flattened padded image, and all 8 rows are written as one dense
#    (K^2-1, Qpad) store.  Grid = (N,) -> one launch, pipelined across images.
# ----------------------------------------------------------------------------
def _color_similarity_kernel(img_ref, msk_ref, o_ref, *, taps, center_off, q_out):
    # img_ref: (1, C, Lp) f32 ; msk_ref: (1, 1, Lp) f32 ; o_ref: (1, K^2-1, Qp) f32
    center = img_ref[0, :, center_off:center_off + q_out]       # (C, Qp)
    rows = []
    for delta in taps:                                           # 8 static taps
        nb = img_ref[0, :, delta:delta + q_out]                  # (C, Qp)
        d = center - nb
        l2 = jnp.sqrt(jnp.sum(d * d, axis=0, keepdims=True))     # (1, Qp)
        sim = jnp.exp(l2 * -0.5)                                 # EUP
        w = msk_ref[0, :, delta:delta + q_out]                   # (1, Qp)
        rows.append(sim * w)
    o_ref[0] = jnp.concatenate(rows, axis=0)                     # one dense store


def images_color_similarity(images_ds, masks_ds, kernel_size, dilation):
    """images_ds: (N, C, Hd, Wd) f32 ; masks_ds: (N, Hd, Wd) -> (N, K^2-1, Hd, Wd)."""
    assert kernel_size % 2 == 1, "unfold_wo_center requires an odd kernel_size"
    N, C, Hd, Wd = images_ds.shape
    pad = (kernel_size + (dilation - 1) * (kernel_size - 1)) // 2
    Hp, Wp = Hd + 2 * pad, Wd + 2 * pad
    Q = Hp * Wp
    E = pad * Wp + pad                      # flat offset of the centre tap
    Qp = _round_up(Q, 128)                  # lane-dense output width
    Lp = _round_up(Qp + 2 * E, 128)
    k2m1 = kernel_size * kernel_size - 1

    imgs_p = jnp.pad(images_ds.astype(jnp.float32),
                     ((0, 0), (0, 0), (pad, pad), (pad, pad)))
    imgs_f = jnp.pad(imgs_p.reshape(N, C, Q), ((0, 0), (0, 0), (E, Lp - Q - E)))
    msk_p = jnp.pad(masks_ds.astype(jnp.float32), ((0, 0), (pad, pad), (pad, pad)))
    msk_f = jnp.pad(msk_p.reshape(N, 1, Q), ((0, 0), (0, 0), (E, Lp - Q - E)))

    taps = tuple(ky * dilation * Wp + kx * dilation
                 for ky in range(kernel_size) for kx in range(kernel_size)
                 if not (ky == kernel_size // 2 and kx == kernel_size // 2))
    kern = functools.partial(_color_similarity_kernel,
                             taps=taps, center_off=E, q_out=Qp)

    # NOTE: the per-image blocks are the *downsampled* image (<~1 MB even at
    # production sizes), so whole-image blocks fit default scoped VMEM on all
    # generations incl. v7x; for very large inputs the flat axis can be
    # windowed exactly like controller_conv().
    out = pl.pallas_call(
        kern,
        out_shape=jax.ShapeDtypeStruct((N, k2m1, Qp), jnp.float32),
        grid=(N,),
        in_specs=[
            pl.BlockSpec((1, C, Lp), lambda n: (n, 0, 0)),
            pl.BlockSpec((1, 1, Lp), lambda n: (n, 0, 0)),
        ],
        out_specs=pl.BlockSpec((1, k2m1, Qp), lambda n: (n, 0, 0)),
        compiler_params=pltpu.CompilerParams(
            dimension_semantics=("parallel",)),
        cost_estimate=pl.CostEstimate(
            flops=N * k2m1 * Qp * (3 * C + 3),
            transcendentals=2 * N * k2m1 * Qp,
            bytes_accessed=(N * (C + 1) * Lp + N * k2m1 * Qp) * 4),
    )(imgs_f, msk_f)

    # cheap wrapper un-flatten + drop padded border positions
    return out[:, :, :Q].reshape(N, k2m1, Hp, Wp)[:, :, pad:pad + Hd, pad:pad + Wd]


# ----------------------------------------------------------------------------
# add_bitmasks_from_boxes glue: avg-pool downsample + BGR->RGB flip, one fused
# XLA expression over the raw image (no separate pool / flip passes).
# ----------------------------------------------------------------------------
def downsample_and_flip(images, stride):
    N, C, H, W = images.shape
    ds = images.reshape(N, C, H // stride, stride, W // stride, stride).mean(axis=(3, 5))
    return ds[:, ::-1]   # == [:, [2, 1, 0]] for 3 channels


# ----------------------------------------------------------------------------
# Pure-JAX references (correctness checks only).
# ----------------------------------------------------------------------------
def _ref_normalize(x, mean, std):
    return (x - mean.reshape(1, -1, 1, 1)) / std.reshape(1, -1, 1, 1)


def _ref_conv(x, w, b):
    y = lax.conv_general_dilated(
        x, w, window_strides=(1, 1), padding="SAME",
        dimension_numbers=("NCHW", "OIHW", "NCHW"))
    return y + b.reshape(1, -1, 1, 1)


def _ref_color_similarity(images, masks, ksize, dilation):
    N, C, Hs, Ws = images.shape
    pad = (ksize + (dilation - 1) * (ksize - 1)) // 2
    ip = jnp.pad(images, ((0, 0), (0, 0), (pad, pad), (pad, pad)))
    mp = jnp.pad(masks, ((0, 0), (pad, pad), (pad, pad)))
    center = ip[:, :, pad:pad + Hs, pad:pad + Ws]
    outs = []
    for ky in range(ksize):
        for kx in range(ksize):
            if ky == ksize // 2 and kx == ksize // 2:
                continue
            oy, ox = ky * dilation, kx * dilation
            d = center - ip[:, :, oy:oy + Hs, ox:ox + Ws]
            sim = jnp.exp(-jnp.sqrt(jnp.sum(d * d, axis=1)) * 0.5)
            outs.append(sim * mp[:, oy:oy + Hs, ox:ox + Ws])
    return jnp.stack(outs, axis=1)


# ----------------------------------------------------------------------------
if __name__ == "__main__":
    key = jax.random.PRNGKey(0)
    k1, k2, k3 = jax.random.split(key, 3)

    # synthetic batched inputs (small shapes)
    N, C, H, W = 2, 3, 32, 32
    images = jax.random.uniform(k1, (N, C, H, W), jnp.float32) * 255.0

    # cfg.MODEL.PIXEL_MEAN / PIXEL_STD
    pixel_mean = jnp.array([103.53, 116.28, 123.675], jnp.float32)
    pixel_std = jnp.array([57.375, 57.12, 58.395], jnp.float32)

    # 1) normalizer (Pallas, lane-dense, multiply by 1/std)
    images_norm = pixel_normalize(images, pixel_mean, pixel_std)
    np.testing.assert_allclose(
        np.asarray(images_norm),
        np.asarray(_ref_normalize(images, pixel_mean, pixel_std)),
        rtol=1e-5, atol=1e-5)

    # 2) controller conv (Pallas, in-kernel im2col, bf16 MXU, f32 accumulate)
    # TODO(synk): backbone / FPN / proposal generator / mask branch+head are
    # external detectron2 builders; we feed a synthetic FPN-like feature map.
    Cin, Hf, Wf = 8, 16, 16
    num_gen_params = 16
    feats = jax.random.normal(k2, (N, Cin, Hf, Wf), jnp.float32)
    w_ctrl = 0.01 * jax.random.normal(k3, (num_gen_params, Cin, 3, 3), jnp.float32)
    b_ctrl = jnp.zeros((num_gen_params,), jnp.float32)
    ctrl_out = controller_conv(feats, w_ctrl, b_ctrl)
    np.testing.assert_allclose(
        np.asarray(ctrl_out), np.asarray(_ref_conv(feats, w_ctrl, b_ctrl)),
        rtol=3e-2, atol=3e-3)   # bf16 MXU inputs vs f32 reference

    # 3) add_bitmasks_from_boxes colour-similarity path (Pallas, batched over N)
    mask_out_stride = 4
    start = mask_out_stride // 2
    boundary_size, boundary_dilation = 3, 2
    ds = downsample_and_flip(images, mask_out_stride)            # (N, 3, 8, 8)
    # TODO(synk): skimage.color.rgb2lab is a host-side numpy op with no clean
    # Pallas equivalent; the similarity kernel consumes the downsampled
    # channels directly.
    image_masks = jnp.ones((N, H, W), jnp.float32)
    masks_ds = image_masks[:, start::mask_out_stride, start::mask_out_stride]
    sims = images_color_similarity(ds, masks_ds, boundary_size, boundary_dilation)
    np.testing.assert_allclose(
        np.asarray(sims),
        np.asarray(_ref_color_similarity(ds, masks_ds, boundary_size,
                                         boundary_dilation)),
        rtol=1e-5, atol=1e-5)

    jax.block_until_ready((images_norm, ctrl_out, sims))
    print("KERNEL_OK")
</pallas_src>

<mosaic_0001>
module attributes {stable_mosaic.version = 11 : i64} {
  func.func @_normalize_kernel(%arg0: i32, %arg1: i32, %arg2: memref<1x3x1024xf32, #tpu.memory_space<vmem>>, %arg3: memref<3x1xf32, #tpu.memory_space<vmem>>, %arg4: memref<3x1xf32, #tpu.memory_space<vmem>>, %arg5: memref<1x3x1024xf32, #tpu.memory_space<vmem>>) attributes {dimension_semantics = [#tpu.dimension_semantics<parallel>, #tpu.dimension_semantics<parallel>], iteration_bounds = array<i64: 2, 1>, scalar_prefetch = 0 : i64, scratch_operands = 0 : i64, tpu.core_type = #tpu.core_type<tc>, window_params = [{transform_indices = @transform_0, window_bounds = array<i64: 1, 3, 1024>}, {pipeline_mode = #tpu.pipeline_mode<synchronous>, transform_indices = @transform_1, window_bounds = array<i64: 3, 1>}, {pipeline_mode = #tpu.pipeline_mode<synchronous>, transform_indices = @transform_2, window_bounds = array<i64: 3, 1>}, {transform_indices = @transform_3, window_bounds = array<i64: 1, 3, 1024>}]} {
    %c0 = arith.constant 0 : index
    %c0_0 = arith.constant 0 : index
    %c0_1 = arith.constant 0 : index
    %0 = vector.load %arg2[%c0, %c0_0, %c0_1] : memref<1x3x1024xf32, #tpu.memory_space<vmem>>, vector<1x3x1024xf32>
    %1 = vector.shape_cast %0 : vector<1x3x1024xf32> to vector<3x1024xf32>
    %c0_2 = arith.constant 0 : index
    %c0_3 = arith.constant 0 : index
    %2 = vector.load %arg3[%c0_2, %c0_3] : memref<3x1xf32, #tpu.memory_space<vmem>>, vector<3x1xf32>
    %3 = vector.broadcast %2 : vector<3x1xf32> to vector<3x1024xf32>
    %4 = arith.subf %1, %3 : vector<3x1024xf32>
    %c0_4 = arith.constant 0 : index
    %c0_5 = arith.constant 0 : index
    %5 = vector.load %arg4[%c0_4, %c0_5] : memref<3x1xf32, #tpu.memory_space<vmem>>, vector<3x1xf32>
    %6 = vector.broadcast %5 : vector<3x1xf32> to vector<3x1024xf32>
    %7 = arith.mulf %4, %6 : vector<3x1024xf32>
    %c0_6 = arith.constant 0 : index
    %c0_7 = arith.constant 0 : index
    %c0_8 = arith.constant 0 : index
    %8 = vector.load %arg5[%c0_6, %c0_7, %c0_8] : memref<1x3x1024xf32, #tpu.memory_space<vmem>>, vector<1x3x1024xf32>
    %9 = vector.shape_cast %8 : vector<1x3x1024xf32> to vector<3x1024xf32>
    %10 = vector.shape_cast %7 : vector<3x1024xf32> to vector<1x3x1024xf32>
    tpu.vector_store %arg5[%c0_6, %c0_7, %c0_8], %10 {strides = array<i32>} : memref<1x3x1024xf32, #tpu.memory_space<vmem>>, vector<1x3x1024xf32>,
    return
  }
  func.func @transform_0(%arg0: i32, %arg1: i32) -> (i32, i32, i32) {
    %c0_i32 = arith.constant 0 : i32
    %c0_i32_0 = arith.constant 0 : i32
    return %arg0, %c0_i32, %arg1 : i32, i32, i32
  }
  func.func @transform_1(%arg0: i32, %arg1: i32) -> (i32, i32) {
    %c0_i32 = arith.constant 0 : i32
    %c0_i32_0 = arith.constant 0 : i32
    %c0_i32_1 = arith.constant 0 : i32
    return %c0_i32, %c0_i32_0 : i32, i32
  }
  func.func @transform_2(%arg0: i32, %arg1: i32) -> (i32, i32) {
    %c0_i32 = arith.constant 0 : i32
    %c0_i32_0 = arith.constant 0 : i32
    %c0_i32_1 = arith.constant 0 : i32
    return %c0_i32, %c0_i32_0 : i32, i32
  }
  func.func @transform_3(%arg0: i32, %arg1: i32) -> (i32, i32, i32) {
    %c0_i32 = arith.constant 0 : i32
    %c0_i32_0 = arith.constant 0 : i32
    return %arg0, %c0_i32, %arg1 : i32, i32, i32
  }
}

</mosaic_0001>

<bundles_post_ra>
// kernel: tpu_custom_call.1
= control target key start
LH: loop header
LB: loop body
LE: loop exit
PB: predicated region body
PF: predicated region fallthrough
CT: control target
= control target key end

     0   :  { %s425_s12 = smov 0   ;;  %s427_s13 = smov 0   ;;  %s464_s0 = inlined_call_operand.vmem [shape: f32[2,3,1024], index: 0, kind: input, shape index: {}]   ;;  %s465_s1 = inlined_call_operand.vmem [shape: f32[3,1], index: 1, kind: input, shape index: {}]   ;;  %s466_s2 = inlined_call_operand.vmem [shape: f32[3,1], index: 2, kind: input, shape index: {}]   ;;  %s467_s3 = inlined_call_operand.vmem [shape: f32[2,3,1024], index: 3, kind: output, shape index: {}]  }
   0x1   :  { %s429_s14 = smov 0  }
   0x2 LB: > { %s25_s15 = sadd.s32 1, %s397_s13  ;;  %p343_p0 = scmp.ge.s32.totalorder %s401_s14, 1  ;;  %s401_s14 = sphi %s429_s14, %s13_s14   ;;  %s397_s13 = sphi %s427_s13, %s469_s13   ;;  %s393_s12 = sphi %s425_s12, %s468_s12  }
   0x3   : > { %p27_p1 = scmp.ge.s32.totalorder %s25_s15, 2  ;;  %p158_p2 = scmp.lt.s32.totalorder %s401_s14, 3 }
   0x5   : > { %s471_s15 = smov (%p27_p1, %s25_s15), 0  ;;  %p159_p3 = pnand %p343_p0, %p158_p2 }
   0x6   : > { %v214_v0 = vld [vmem:[%s465_s1] sm:$0x7] (!%p159_p3)  ;;  %v403_v1 = vmov (!%p159_p3), 0   ;;  %p191_p4 = scmp.lt.s32.totalorder (!%p159_p3), %s393_s12, 1  ;;  %v404_v3 = vmov (!%p159_p3), 839922192   ;;  %v222_v5 = vlaneseq (!%p159_p3) }
   0x7   : > { %162 = sbr.rel (%p159_p3) target bundleno = 146 (0x92), region = 32  ;;  %378 = vset.pattern.permute.xlu0 (!%p159_p3), %v403_v1  ;;  %v231_v2 = vld [vmem:[%s466_s2] sm:$0x7] (!%p159_p3)  ;;  %v220_v4 = vunpack.c.l.s4 (!%p159_p3), %v404_v3 }
   0x8   : > { %217 = vperm.xlu0 (!%p159_p3), %378, %v214_v0   ;;  %v223_v7 = vshrl.u32 (!%p159_p3), %v222_v5, 7 }
   0x9   : > { %v221_v6 = vunpack.c.0.s8 (!%p159_p3), %v220_v4 }
   0xb   : > { %v224_v8 = vsub.s32 (!%p159_p3), %v221_v6, %v223_v7 }
   0xc   : > { %234 = vperm.xlu0 (!%p159_p3), %378, %v231_v2  }
   0xe   : > { %s473_s12 = smov (!%p191_p4, %s393_s12), 1 }
   0xf   : > { %s350_s20 = sshll.u32 %s473_s12, 5 }
  0x10   : > { %s198_s23 = scalar_lea.vmem %s464_s0, %s350_s20  ;;  %s208_s26 = scalar_lea.vmem %s467_s3, %s350_s20 }
  0x11   : > { %v210_v10 = vld [vmem:[%s198_s23] sm:$0x77]  ;;  %v211_v12 = vld [vmem:[%s198_s23 + $0x8] sm:$0x77]  ;;  %v212_v13 = vld [vmem:[%s198_s23 + $0x10] sm:$0x77] }
  0x12   : > { %v213_v14 = vld [vmem:[%s198_s23 + $0x18] sm:$0x77] }
  0x87   : > { %v218_v9 = vpop.permute.xlu0 %217 }
  0x88   : > { %v225_v11 = vrot.slane %v218_v9, %v224_v8 }
  0x8a   : > { %v227_v15 = vsub.f32 %v210_v10, %v225_v11  ;;  %v228_v17 = vsub.f32 %v211_v12, %v225_v11  ;;  %v229_v18 = vsub.f32 %v212_v13, %v225_v11  ;;  %v230_v19 = vsub.f32 %v213_v14, %v225_v11 }
  0x8b   : > { %v235_v16 = vpop.permute.xlu0 %234 }
  0x8c   : > { %v242_v20 = vrot.slane %v235_v16, %v224_v8 }
  0x8e   : > { %v244_v21 = vmul.f32 %v242_v20, %v227_v15  ;;  %v245_v22 = vmul.f32 %v242_v20, %v228_v17  ;;  %v246_v23 = vmul.f32 %v242_v20, %v229_v18  ;;  %v247_v24 = vmul.f32 %v242_v20, %v230_v19 }
  0x90   : > { %248 = vst [vmem:[%s208_s26] sm:$0x77] %v244_v21  ;;  %249 = vst [vmem:[%s208_s26 + $0x8] sm:$0x77] %v245_v22 }
  0x91   : > { %250 = vst [vmem:[%s208_s26 + $0x10] sm:$0x77] %v246_v23  ;;  %251 = vst [vmem:[%s208_s26 + $0x18] sm:$0x77] %v247_v24 }
  0x92 PF: > { %s13_s14 = sadd.s32 1, %s401_s14   ;;  %s468_s12 = smov %s397_s13 }
  0x93   : > { %p10_p5 = scmp.ge.s32.totalorder %s13_s14, 4   ;;  %s469_s13 = smov %s471_s15 }
  0x95   :  { %12 = sbr.rel (!%p10_p5) target bundleno = 2 (0x2), region = 62 }

</bundles_post_ra>
